<compile_context>
chip_gen: v7x
topology: tpu7x:2x2x1
jax: 0.10.0
libtpu: 0.0.40
codegen_flags: <defaults>
</compile_context>

<pallas_src>
import functools

import jax
import jax.numpy as jnp
from jax.experimental import pallas as pl
from jax.experimental.pallas import tpu as pltpu


# ----------------------------------------------------------------------------
# Small helpers
# ----------------------------------------------------------------------------
def _round_up(n, m):
    return (n + m - 1) // m * m


def _vmem_limit_bytes():
    """~60% of this generation's VMEM (v5e/v6e: 128 MiB, v7x: 64 MiB)."""
    cap = 64 * 1024 * 1024  # assume the smallest generation if query fails
    try:
        info = pltpu.get_tpu_info()
        cap = int(getattr(info, "vmem_capacity_bytes", cap) or cap)
    except Exception:
        pass
    return max(32 * 1024 * 1024, min(cap * 3 // 5, 100 * 1024 * 1024))


_VMEM_LIMIT = _vmem_limit_bytes()
_ONEHOT_BUDGET = 8 * 1024 * 1024  # cap for the (K, TP) one-hot temporary


def _pick_tile(n, cap):
    """Largest multiple of 128 <= cap that divides n (n is a multiple of 128,
    or n itself is returned when n <= 128)."""
    if n <= 128:
        return n
    t = min(cap, n)
    t = max(128, t - (t % 128))
    while n % t:
        t -= 128
    return t


# ----------------------------------------------------------------------------
# Kernel 1: fused 1x1 conv + offset scaling + coordinate normalization
#   o_c,p = (W_f x)_c,p + b_f_c + d_{axis(c),p}
# with W_f = (0.5/norm_c) * W,  b_f = (2/norm_c)*(0.25*b + init_pos),
#      d_x = 2*(w+0.5)/W - 1,   d_y = 2*(h+0.5)/H - 1.
# Blocks: x (1, Cin, TM), out (1, Cout, TM)  (lane-dense over TM).
# ----------------------------------------------------------------------------
def _offset_coords_kernel(x_ref, wt_ref, b_ref, d_ref, o_ref):
    x = x_ref[0]                                   # (Cin, TM)
    y = jnp.dot(wt_ref[...], x, preferred_element_type=jnp.float32)
    y = y + b_ref[...]                             # (Cout, TM)
    cout, tm = y.shape
    half = cout // 2                               # first half: x-axis coords
    d0 = jnp.broadcast_to(d_ref[0:1, :], (half, tm))
    d1 = jnp.broadcast_to(d_ref[1:2, :], (cout - half, tm))
    o_ref[0] = (y + jnp.concatenate([d0, d1], axis=0)).astype(o_ref.dtype)


def offset_coords_nchw(x3, wt_f, b_f, dgrid):
    """x3: (B, Cin, HW) -> normalized pre-shuffle coords (B, Cout, HW)."""
    B, Cin, HW = x3.shape
    Cout = wt_f.shape[0]
    HWp = _round_up(HW, 128)
    if HWp != HW:  # pad to a multiple of 128 -> lane-dense, unmasked stores
        x3 = jnp.pad(x3, ((0, 0), (0, 0), (0, HWp - HW)))
        dgrid = jnp.pad(dgrid, ((0, 0), (0, HWp - HW)))
    TM = _pick_tile(HWp, 4096)
    if B * (HWp // TM) < 2 and HWp >= 256:   # keep both v7x cores busy
        TM = _pick_tile(HWp, HWp // 2)
    grid = (B, HWp // TM)
    out = pl.pallas_call(
        _offset_coords_kernel,
        out_shape=jax.ShapeDtypeStruct((B, Cout, HWp), x3.dtype),
        grid=grid,
        in_specs=[
            pl.BlockSpec((1, Cin, TM), lambda b_, j: (b_, 0, j)),
            pl.BlockSpec((Cout, Cin), lambda b_, j: (0, 0)),
            pl.BlockSpec((Cout, 1), lambda b_, j: (0, 0)),
            pl.BlockSpec((2, TM), lambda b_, j: (0, j)),
        ],
        out_specs=pl.BlockSpec((1, Cout, TM), lambda b_, j: (b_, 0, j)),
        compiler_params=pltpu.CompilerParams(
            dimension_semantics=("parallel", "parallel"),
            vmem_limit_bytes=_VMEM_LIMIT,
        ),
    )(x3, wt_f, b_f, dgrid)
    return out[:, :, :HW] if HWp != HW else out


# ----------------------------------------------------------------------------
# Kernel 2: grid_sample (bilinear, align_corners=False, padding='border')
# One-hot construction shared by both paths.
# ----------------------------------------------------------------------------
def _bilinear_onehot(gx, gy, H, W, k_start, k_size, compute_dtype):
    """gx, gy: (1, TP) normalized coords -> one-hot weights (k_size, TP)."""
    fW, fH = float(W), float(H)
    ix = jnp.clip(((gx + 1.0) * fW - 1.0) * 0.5, 0.0, fW - 1.0)
    iy = jnp.clip(((gy + 1.0) * fH - 1.0) * 0.5, 0.0, fH - 1.0)
    x0f = jnp.floor(ix)
    y0f = jnp.floor(iy)
    wx1 = ix - x0f
    wx0 = 1.0 - wx1
    wy1 = iy - y0f
    wy0 = 1.0 - wy1
    x0 = x0f.astype(jnp.int32)
    y0 = y0f.astype(jnp.int32)
    x1 = jnp.minimum(x0 + 1, W - 1)                # border clamp (weight is 0
    y1 = jnp.minimum(y0 + 1, H - 1)                # whenever the clamp bites)
    # flat source indices in int32 (no f32-precision constraint on H*W),
    # shifted into this K tile's local frame
    i00 = y0 * W + x0 - k_start
    i01 = y0 * W + x1 - k_start
    i10 = y1 * W + x0 - k_start
    i11 = y1 * W + x1 - k_start
    q = jax.lax.broadcasted_iota(jnp.int32, (k_size, 1), 0)    # (K, 1)
    oh = jnp.where(q == i00, wy0 * wx0, 0.0)
    oh = oh + jnp.where(q == i01, wy0 * wx1, 0.0)
    oh = oh + jnp.where(q == i10, wy1 * wx0, 0.0)
    oh = oh + jnp.where(q == i11, wy1 * wx1, 0.0)              # (K, TP)
    return oh.astype(compute_dtype)


def _grid_sample_direct_kernel(img_ref, coords_ref, o_ref, *, H, W, groups,
                               mxu_dtype):
    """Whole-image-in-VMEM path: no reduction axis, no accumulator."""
    C = img_ref.shape[1]
    HW = img_ref.shape[2]
    Cg = C // groups
    for gr in range(groups):                                   # static unroll
        gx = coords_ref[0, gr:gr + 1, :]                       # (1, TP)
        gy = coords_ref[0, groups + gr:groups + gr + 1, :]     # (1, TP)
        onehot = _bilinear_onehot(gx, gy, H, W, 0, HW, mxu_dtype)
        img_g = img_ref[0, gr * Cg:(gr + 1) * Cg, :].astype(mxu_dtype)
        res = jnp.dot(img_g, onehot, preferred_element_type=jnp.float32)
        o_ref[0, gr * Cg:(gr + 1) * Cg, :] = res.astype(o_ref.dtype)


def _grid_sample_ktiled_kernel(img_ref, coords_ref, o_ref, *, H, W, groups,
                               mxu_dtype):
    """Fallback for images too large for VMEM residency: reduce over source
    tiles, accumulating directly into the resident output block."""
    kk = pl.program_id(2)
    C = img_ref.shape[1]
    TK = img_ref.shape[2]
    Cg = C // groups
    k_start = kk * TK

    @pl.when(kk == 0)
    def _init():
        o_ref[...] = jnp.zeros_like(o_ref)

    for gr in range(groups):                                   # static unroll
        gx = coords_ref[0, gr:gr + 1, :]
        gy = coords_ref[0, groups + gr:groups + gr + 1, :]
        onehot = _bilinear_onehot(gx, gy, H, W, k_start, TK, mxu_dtype)
        img_g = img_ref[0, gr * Cg:(gr + 1) * Cg, :].astype(mxu_dtype)
        res = jnp.dot(img_g, onehot, preferred_element_type=jnp.float32)
        sl = slice(gr * Cg, (gr + 1) * Cg)
        o_ref[0, sl, :] = o_ref[0, sl, :] + res.astype(o_ref.dtype)


def grid_sample_fused(img3, coords, H, W, groups, *, mxu_dtype=jnp.float32,
                      force_ktiled=False):
    """img3: (B, C, HW); coords: (B, 2*groups, P) -> (B, C, P)."""
    B, C, HW = img3.shape
    P = coords.shape[-1]
    Pp = _round_up(P, 128)
    if Pp != P:
        coords = jnp.pad(coords, ((0, 0), (0, 0), (0, Pp - P)))

    esize = 2 if mxu_dtype == jnp.bfloat16 else 4
    direct_ok = (not force_ktiled
                 and C * HW * img3.dtype.itemsize <= 4 * 1024 * 1024
                 and _ONEHOT_BUDGET // (HW * esize) >= 128)

    if direct_ok:
        TP = _pick_tile(Pp, min(2048, _ONEHOT_BUDGET // (HW * esize)))
        if B * (Pp // TP) < 2 and Pp >= 256:       # keep both v7x cores busy
            TP = _pick_tile(Pp, Pp // 2)
        grid = (B, Pp // TP)
        kern = functools.partial(_grid_sample_direct_kernel, H=H, W=W,
                                 groups=groups, mxu_dtype=mxu_dtype)
        out = pl.pallas_call(
            kern,
            out_shape=jax.ShapeDtypeStruct((B, C, Pp), img3.dtype),
            grid=grid,
            in_specs=[
                # image block index is independent of the output-tile axis ->
                # DMA'd from HBM once per batch (no re-streaming per tile)
                pl.BlockSpec((1, C, HW), lambda b, j: (b, 0, 0)),
                pl.BlockSpec((1, 2 * groups, TP), lambda b, j: (b, 0, j)),
            ],
            out_specs=pl.BlockSpec((1, C, TP), lambda b, j: (b, 0, j)),
            compiler_params=pltpu.CompilerParams(
                dimension_semantics=("parallel", "parallel"),
                vmem_limit_bytes=_VMEM_LIMIT,
            ),
        )(img3, coords)
    else:
        HWp = _round_up(HW, 128)
        img_p = (jnp.pad(img3, ((0, 0), (0, 0), (0, HWp - HW)))
                 if HWp != HW else img3)
        TK = _pick_tile(HWp, 512)
        TP = _pick_tile(Pp, min(2048, max(128, _ONEHOT_BUDGET // (TK * esize))))
        if B * (Pp // TP) < 2 and Pp >= 256:
            TP = _pick_tile(Pp, Pp // 2)
        grid = (B, Pp // TP, HWp // TK)
        kern = functools.partial(_grid_sample_ktiled_kernel, H=H, W=W,
                                 groups=groups, mxu_dtype=mxu_dtype)
        out = pl.pallas_call(
            kern,
            out_shape=jax.ShapeDtypeStruct((B, C, Pp), img3.dtype),
            grid=grid,
            in_specs=[
                pl.BlockSpec((1, C, TK), lambda b, j, k: (b, 0, k)),
                pl.BlockSpec((1, 2 * groups, TP), lambda b, j, k: (b, 0, j)),
            ],
            out_specs=pl.BlockSpec((1, C, TP), lambda b, j, k: (b, 0, j)),
            compiler_params=pltpu.CompilerParams(
                dimension_semantics=("parallel", "parallel", "arbitrary"),
                vmem_limit_bytes=_VMEM_LIMIT,
            ),
        )(img_p, coords)
    return out[:, :, :P] if Pp != P else out


# ----------------------------------------------------------------------------
# Coordinate glue: only the pixel_shuffle rearrangement remains in JAX
# (normalization was folded into the conv kernel).
# ----------------------------------------------------------------------------
def _pixel_shuffle_coords(coords_pre, scale, groups, H, W):
    """coords_pre: (B, 2*g*s*s, H*W) normalized -> (B, 2*g, sH*sW)
    channel order: [x_g0..x_g(g-1), y_g0..y_g(g-1)] (matches the torch code)."""
    B = coords_pre.shape[0]
    s, g = scale, groups
    c = coords_pre.reshape(B, 2 * g, s, s, H, W)
    c = c.transpose(0, 1, 4, 2, 5, 3).reshape(B, 2 * g, s * H * s * W)
    return c


# ----------------------------------------------------------------------------
# Module
# ----------------------------------------------------------------------------
class DySamplePallas:
    """DySample (style='lp', dyscope=False) with Pallas TPU kernels."""

    def __init__(self, in_channels, scale=2, groups=4, key=None, mxu_bf16=False):
        assert in_channels >= groups and in_channels % groups == 0
        self.scale = scale
        self.groups = groups
        self.mxu_dtype = jnp.bfloat16 if mxu_bf16 else jnp.float32
        out_ch = 2 * groups * scale * scale
        # nn.Conv2d(in_channels, out_ch, 1): weight ~ N(0, 0.001), bias = 0
        w = jax.random.normal(key, (in_channels, out_ch), jnp.float32) * 0.001
        b = jnp.zeros((out_ch,), jnp.float32)
        init_pos = self._init_pos()                      # (out_ch,)
        # Fold  (* 0.25 + init_pos)  into the conv constants (host side).
        # The 2/normalizer factor depends on H/W and is folded in __call__.
        self.wt = jnp.transpose(0.25 * w)                # (out_ch, in_ch)
        self.bf = (0.25 * b + init_pos).reshape(out_ch, 1)
        # Unfused params kept for the pure-JAX reference.
        self.w, self.b, self.init_pos = w, b, init_pos

    def _init_pos(self):
        s, g = self.scale, self.groups
        h = (jnp.arange(s, dtype=jnp.float32) - (s - 1) / 2.0) / s
        gi, gj = jnp.meshgrid(h, h, indexing="ij")
        t = jnp.stack([gi, gj])                 # (2, s, s)
        t = jnp.transpose(t, (0, 2, 1))         # .transpose(1, 2)
        t = jnp.tile(t, (1, g, 1))              # .repeat(1, groups, 1)
        return t.reshape(-1)                    # (2*g*s*s,)

    def __call__(self, x, force_ktiled=False):  # x: NCHW float32
        B, C, H, W = x.shape
        s, g = self.scale, self.groups
        gs2 = g * s * s
        dt = x.dtype
        x3 = x.reshape(B, C, H * W)

        # Fold the grid_sample normalization (2/norm) into weights & bias.
        norm_scale = jnp.concatenate(
            [jnp.full((gs2, 1), 2.0 / W, jnp.float32),
             jnp.full((gs2, 1), 2.0 / H, jnp.float32)], axis=0)
        wt_f = (self.wt * norm_scale).astype(dt)         # (Cout, Cin)
        bf_f = (self.bf * norm_scale).astype(dt)         # (Cout, 1)

        # Pixel-grid term d = 2*(base + 0.5)/norm - 1, shape (2, HW).
        ww = (jnp.arange(W, dtype=jnp.float32) + 0.5) * (2.0 / W) - 1.0
        hh = (jnp.arange(H, dtype=jnp.float32) + 0.5) * (2.0 / H) - 1.0
        dgrid = jnp.stack([
            jnp.broadcast_to(ww[None, :], (H, W)).reshape(-1),
            jnp.broadcast_to(hh[:, None], (H, W)).reshape(-1),
        ]).astype(dt)

        # (1) fused conv + scaling + normalization  [Pallas]
        coords_pre = offset_coords_nchw(x3, wt_f, bf_f, dgrid)   # (B, Cout, HW)
        # (2) pixel_shuffle rearrangement (index glue)
        coords = _pixel_shuffle_coords(coords_pre, s, g, H, W)   # (B, 2g, P)
        # (3) bilinear grid_sample with border padding  [Pallas]
        out = grid_sample_fused(x3, coords, H, W, g,
                                mxu_dtype=self.mxu_dtype,
                                force_ktiled=force_ktiled)       # (B, C, P)
        return out.reshape(B, C, s * H, s * W)


# ----------------------------------------------------------------------------
# Pure-JAX reference (unfused params) for a correctness spot-check
# ----------------------------------------------------------------------------
def _build_coords_ref(dtype, off_nchw, scale, groups, H, W):
    B = off_nchw.shape[0]
    s, g = scale, groups
    sH, sW = s * H, s * W
    off5 = off_nchw.reshape(B, 2, g * s * s, H, W)
    cw = jnp.arange(W, dtype=dtype) + 0.5
    ch = jnp.arange(H, dtype=dtype) + 0.5
    c0 = jnp.broadcast_to(cw[None, :], (H, W))
    c1 = jnp.broadcast_to(ch[:, None], (H, W))
    coords = jnp.stack([c0, c1])[None, :, None]
    norm = jnp.array([W, H], dtype=dtype).reshape(1, 2, 1, 1, 1)
    coords = 2.0 * (coords + off5) / norm - 1.0
    coords = coords.reshape(B, 2 * g, s, s, H, W)
    coords = coords.transpose(0, 1, 4, 2, 5, 3).reshape(B, 2 * g, sH * sW)
    return coords


def _ref_grid_sample(img, gx, gy, H, W):
    fW, fH = float(W), float(H)
    ix = jnp.clip(((gx + 1.0) * fW - 1.0) * 0.5, 0.0, fW - 1.0)
    iy = jnp.clip(((gy + 1.0) * fH - 1.0) * 0.5, 0.0, fH - 1.0)
    x0 = jnp.floor(ix)
    y0 = jnp.floor(iy)
    wx1, wy1 = ix - x0, iy - y0
    wx0, wy0 = 1.0 - wx1, 1.0 - wy1
    x0i = x0.astype(jnp.int32)
    x1i = jnp.minimum(x0 + 1.0, fW - 1.0).astype(jnp.int32)
    y0i = y0.astype(jnp.int32)
    y1i = jnp.minimum(y0 + 1.0, fH - 1.0).astype(jnp.int32)

    def gather(idx):
        return jnp.take_along_axis(img, idx[:, None, :], axis=2)

    v00 = gather(y0i * W + x0i)
    v01 = gather(y0i * W + x1i)
    v10 = gather(y1i * W + x0i)
    v11 = gather(y1i * W + x1i)
    return ((wy0 * wx0)[:, None, :] * v00 + (wy0 * wx1)[:, None, :] * v01
            + (wy1 * wx0)[:, None, :] * v10 + (wy1 * wx1)[:, None, :] * v11)


def reference_forward(mod, x):
    B, C, H, W = x.shape
    s, g = mod.scale, mod.groups
    x_flat = jnp.transpose(x, (0, 2, 3, 1)).reshape(B, H * W, C)
    off = (x_flat @ mod.w + mod.b[None, None, :]) * 0.25 + mod.init_pos[None, None, :]
    off = off.reshape(B, H, W, -1).transpose(0, 3, 1, 2)       # (B, Cout, H, W)
    coords = _build_coords_ref(x.dtype, off, s, g, H, W)       # (B, 2g, P)
    gx = coords[:, :g, :].reshape(B * g, -1)
    gy = coords[:, g:, :].reshape(B * g, -1)
    img = x.reshape(B * g, C // g, H * W)
    out = _ref_grid_sample(img, gx, gy, H, W)                  # (B*g, C/g, P)
    return out.reshape(B, C, s * H, s * W)


# ----------------------------------------------------------------------------
if __name__ == "__main__":
    key = jax.random.PRNGKey(0)
    kx, kw = jax.random.split(key)

    B, C, H, W = 2, 4, 16, 16
    x = jax.random.normal(kx, (B, C, H, W), jnp.float32)

    mod = DySamplePallas(in_channels=C, scale=2, groups=4, key=kw)
    ref = jax.block_until_ready(reference_forward(mod, x))

    # Path 1: direct path (image resident in VMEM, no reduction axis).
    out = jax.block_until_ready(mod(x))
    assert out.shape == (B, C, 2 * H, 2 * W), out.shape
    err = float(jnp.max(jnp.abs(out - ref)))
    assert jnp.allclose(out, ref, atol=1e-4, rtol=1e-4), err

    # Path 2: K-tiled fallback (used automatically for oversized images).
    out_kt = jax.block_until_ready(mod(x, force_ktiled=True))
    err_kt = float(jnp.max(jnp.abs(out_kt - ref)))
    assert jnp.allclose(out_kt, ref, atol=1e-4, rtol=1e-4), err_kt

    # Path 3: bf16 MXU operands (fast path on v5e/v6e/v7x MXUs); looser
    # tolerance since the bilinear weights are quantized to bf16.
    mod_bf16 = DySamplePallas(in_channels=C, scale=2, groups=4, key=kw,
                              mxu_bf16=True)
    out_bf = jax.block_until_ready(mod_bf16(x))
    err_bf = float(jnp.max(jnp.abs(out_bf - ref)))
    assert jnp.allclose(out_bf, ref, atol=5e-2, rtol=5e-2), err_bf

    print("KERNEL_OK")
</pallas_src>

<mosaic_0001>
module attributes {stable_mosaic.version = 11 : i64} {
  func.func @_offset_coords_kernel(%arg0: i32, %arg1: i32, %arg2: memref<1x4x256xf32, #tpu.memory_space<vmem>>, %arg3: memref<32x4xf32, #tpu.memory_space<vmem>>, %arg4: memref<32x1xf32, #tpu.memory_space<vmem>>, %arg5: memref<2x256xf32, #tpu.memory_space<vmem>>, %arg6: memref<1x32x256xf32, #tpu.memory_space<vmem>>) attributes {dimension_semantics = [#tpu.dimension_semantics<parallel>, #tpu.dimension_semantics<parallel>], iteration_bounds = array<i64: 2, 1>, scalar_prefetch = 0 : i64, scratch_operands = 0 : i64, tpu.core_type = #tpu.core_type<tc>, window_params = [{transform_indices = @transform_0, window_bounds = array<i64: 1, 4, 256>}, {pipeline_mode = #tpu.pipeline_mode<synchronous>, transform_indices = @transform_1, window_bounds = array<i64: 32, 4>}, {pipeline_mode = #tpu.pipeline_mode<synchronous>, transform_indices = @transform_2, window_bounds = array<i64: 32, 1>}, {transform_indices = @transform_3, window_bounds = array<i64: 2, 256>}, {transform_indices = @transform_4, window_bounds = array<i64: 1, 32, 256>}]} {
    %c0 = arith.constant 0 : index
    %c0_0 = arith.constant 0 : index
    %c0_1 = arith.constant 0 : index
    %0 = vector.load %arg2[%c0, %c0_0, %c0_1] : memref<1x4x256xf32, #tpu.memory_space<vmem>>, vector<1x4x256xf32>
    %1 = vector.shape_cast %0 : vector<1x4x256xf32> to vector<4x256xf32>
    %c0_2 = arith.constant 0 : index
    %c0_3 = arith.constant 0 : index
    %2 = vector.load %arg3[%c0_2, %c0_3] : memref<32x4xf32, #tpu.memory_space<vmem>>, vector<32x4xf32>
    %cst = arith.constant dense<0.000000e+00> : vector<32x256xf32>
    %3 = tpu.matmul %2, %1, %cst {dimension_numbers = #tpu.dot_dimension_numbers<[1], [0], [0], [1], [0, 0, 1, 1], [], []>} : vector<32x4xf32>, vector<4x256xf32>, vector<32x256xf32> -> vector<32x256xf32>
    %c0_4 = arith.constant 0 : index
    %c0_5 = arith.constant 0 : index
    %4 = vector.load %arg4[%c0_4, %c0_5] : memref<32x1xf32, #tpu.memory_space<vmem>>, vector<32x1xf32>
    %5 = vector.broadcast %4 : vector<32x1xf32> to vector<32x256xf32>
    %6 = arith.addf %3, %5 : vector<32x256xf32>
    %c0_6 = arith.constant 0 : index
    %c0_7 = arith.constant 0 : index
    %7 = vector.load %arg5[%c0_6, %c0_7] : memref<2x256xf32, #tpu.memory_space<vmem>>, vector<1x256xf32>
    %8 = vector.shape_cast %7 : vector<1x256xf32> to vector<1x256xf32>
    %9 = vector.broadcast %8 : vector<1x256xf32> to vector<16x256xf32>
    %c1 = arith.constant 1 : index
    %c0_8 = arith.constant 0 : index
    %10 = vector.load %arg5[%c1, %c0_8] : memref<2x256xf32, #tpu.memory_space<vmem>>, vector<1x256xf32>
    %11 = vector.shape_cast %10 : vector<1x256xf32> to vector<1x256xf32>
    %12 = vector.broadcast %11 : vector<1x256xf32> to vector<16x256xf32>
    %13 = tpu.concatenate %9, %12 in 0 : vector<16x256xf32>, vector<16x256xf32> -> vector<32x256xf32>
    %14 = arith.addf %6, %13 : vector<32x256xf32>
    %c0_9 = arith.constant 0 : index
    %c0_10 = arith.constant 0 : index
    %c0_11 = arith.constant 0 : index
    %15 = vector.load %arg6[%c0_9, %c0_10, %c0_11] : memref<1x32x256xf32, #tpu.memory_space<vmem>>, vector<1x32x256xf32>
    %16 = vector.shape_cast %15 : vector<1x32x256xf32> to vector<32x256xf32>
    %17 = vector.shape_cast %14 : vector<32x256xf32> to vector<1x32x256xf32>
    tpu.vector_store %arg6[%c0_9, %c0_10, %c0_11], %17 {strides = array<i32>} : memref<1x32x256xf32, #tpu.memory_space<vmem>>, vector<1x32x256xf32>,
    return
  }
  func.func @transform_0(%arg0: i32, %arg1: i32) -> (i32, i32, i32) {
    %c0_i32 = arith.constant 0 : i32
    %c0_i32_0 = arith.constant 0 : i32
    return %arg0, %c0_i32, %arg1 : i32, i32, i32
  }
  func.func @transform_1(%arg0: i32, %arg1: i32) -> (i32, i32) {
    %c0_i32 = arith.constant 0 : i32
    %c0_i32_0 = arith.constant 0 : i32
    %c0_i32_1 = arith.constant 0 : i32
    return %c0_i32, %c0_i32_0 : i32, i32
  }
  func.func @transform_2(%arg0: i32, %arg1: i32) -> (i32, i32) {
    %c0_i32 = arith.constant 0 : i32
    %c0_i32_0 = arith.constant 0 : i32
    %c0_i32_1 = arith.constant 0 : i32
    return %c0_i32, %c0_i32_0 : i32, i32
  }
  func.func @transform_3(%arg0: i32, %arg1: i32) -> (i32, i32) {
    %c0_i32 = arith.constant 0 : i32
    %c0_i32_0 = arith.constant 0 : i32
    return %c0_i32, %arg1 : i32, i32
  }
  func.func @transform_4(%arg0: i32, %arg1: i32) -> (i32, i32, i32) {
    %c0_i32 = arith.constant 0 : i32
    %c0_i32_0 = arith.constant 0 : i32
    return %arg0, %c0_i32, %arg1 : i32, i32, i32
  }
}

</mosaic_0001>

<bundles_post_ra>
// kernel: tpu_custom_call.1
= control target key start
LH: loop header
LB: loop body
LE: loop exit
PB: predicated region body
PF: predicated region fallthrough
CT: control target
= control target key end

     0   :  { %9 = vsyncpa [#allocation3], 0  ;;  %s884_s0 = inlined_call_operand.vmem [shape: f32[2,4,256], index: 0, kind: input, shape index: {}]   ;;  %s885_s1 = inlined_call_operand.vmem [shape: f32[32,4], index: 1, kind: input, shape index: {}]   ;;  %s886_s2 = inlined_call_operand.vmem [shape: f32[32,1], index: 2, kind: input, shape index: {}]   ;;  %s887_s3 = inlined_call_operand.vmem [shape: f32[2,256], index: 3, kind: input, shape index: {}]   ;;  %s888_s4 = inlined_call_operand.hbm [shape: f32[2,32,256], index: 4, kind: output, shape index: {}]  }
   0x1   :  { %11 = vsyncpa [#allocation3 + $0x1], 0  ;;  %s735_s15 = smov 0   ;;  %s737_s16 = smov 0  }
   0x2   :  { %s739_s17 = smov 0   ;;  %s741_s18 = smov 0  }
   0x3   :  { %s743_s19 = smov 0   ;;  %s745_s20 = smov 0  }
   0x4 LB: > { %s538_s21 = sadd.s32 4294967295, %s703_s20   ;;  %s539_s22 = sadd.s32 4294967294, %s703_s20   ;;  %s703_s20 = sphi %s745_s20, %s17_s20   ;;  %s699_s19 = sphi %s743_s19, %s895_s19   ;;  %s695_s18 = sphi %s741_s18, %s894_s18   ;;  %s691_s17 = sphi %s739_s17, %s893_s17   ;;  %s687_s16 = sphi %s737_s16, %s892_s16   ;;  %s683_s15 = sphi %s735_s15, %s891_s15  }
   0x5   : > { %s29_s23 = sadd.s32 1, %s699_s19  ;;  %s134_s24 = sadd.s32 1, %s691_s17 }
   0x6   : > { %p31_p0 = scmp.ge.s32.totalorder %s29_s23, 2  ;;  %p144_p1 = scmp.ne.s32.totalorder %s691_s17, %s687_s16 }
   0x7   : > { %p145_p2 = scmp.eq.s32.totalorder %s538_s21, 1  ;;  %p150_p3 = scmp.ne.s32.totalorder %s687_s16, %s683_s15 }
   0x8   : > { %s897_s23 = smov (%p31_p0, %s29_s23), 0  ;;  %p151_p5 = scmp.eq.s32.totalorder %s539_s22, 1 }
   0x9   : > { %p775_p4 = por %p145_p2, %p144_p1  ;;  %s129_s26 = ssub.s32 %s699_s19, %s897_s23 }
   0xa   : > { %p543_p6 = scmp.ge.s32.totalorder %s703_s20, 1  ;;  %p132_p7 = scmp.eq.s32.totalorder %s129_s26, 0 }
   0xb   : > { %p782_p8 = por %p151_p5, %p150_p3  ;;  %p197_p9 = scmp.lt.s32.totalorder %s703_s20, 3 }
   0xc   : > { %s788_s28 = scalar_select %p132_p7, %s691_s17, %s134_s24  }
   0xd   : > { %p198_p10 = pnand %p543_p6, %p197_p9 }
   0xe   : > { %p233_p11 = scmp.lt.s32.totalorder (!%p198_p10), %s695_s18, 1  ;;  %v705_v0 = vmov (!%p198_p10), 0.0   ;;  %v256_v1 = vld [vmem:[%s886_s2 + $0x10] sm:$0xff] (!%p198_p10)  ;;  %v706_v2 = vmov (!%p198_p10), 0   ;;  %v254_v3 = vld [vmem:[%s886_s2] sm:$0xff] (!%p198_p10)  ;;  %v257_v4 = vld [vmem:[%s886_s2 + $0x18] sm:$0xff] (!%p198_p10)  ;;  %v389_v12 = vlaneseq (!%p198_p10) }
   0xf   : > { %201 = sbr.rel (%p198_p10) target bundleno = 267 (0x10b), region = 36  ;;  %362 = vmatprep.mubr.f32.mxu0 (!%p198_p10), %v705_v0  ;;  %374 = vmatprep.mubr.f32.mxu1 (!%p198_p10), %v705_v0  ;;  %v255_v5 = vld [vmem:[%s886_s2 + $0x8] sm:$0xff] (!%p198_p10)  ;;  %vm293_vm0 = vcmask (!%p198_p10), 1043456   ;;  %v250_v8 = vld [vmem:[%s885_s1] sm:$0xff] (!%p198_p10)  ;;  %vm280_vm1 = vcmask (!%p198_p10), 31744   ;;  %v252_v9 = vld [vmem:[%s885_s1 + $0x10] sm:$0xff] (!%p198_p10) }
  0x10   : > { %623 = vset.pattern.permute.xlu1 (!%p198_p10), %v706_v2  ;;  %622 = vset.pattern.permute.xlu0 (!%p198_p10), %v706_v2  ;;  %v251_v10 = vld [vmem:[%s885_s1 + $0x8] sm:$0xff] (!%p198_p10)  ;;  %v253_v11 = vld [vmem:[%s885_s1 + $0x18] sm:$0xff] (!%p198_p10)  ;;  %v390_v13 = vshrl.u32 (!%p198_p10), %v389_v12, 7  ;;  %v387_v14 = vld [vmem:[%s887_s3] ss:$2 sm:$0x3] (!%p198_p10) }
  0x11   : > { %270 = vperm.xlu1 (!%p198_p10), %623, %v256_v1   ;;  %260 = vperm.xlu0 (!%p198_p10), %622, %v254_v3   ;;  %s229_s10 = sand.u32 (!%p198_p10), 1, %s687_s16   ;;  %v553_v16 = vld [vmem:[%s887_s3 + $0x1] ss:$2 sm:$0x3] (!%p198_p10)  ;;  %s560_s14 = sshll.u32 (!%p198_p10), %s695_s18, 10 }
  0x12   : > { %v391_v15 = vsub.s32 (!%p198_p10), 0, %v390_v13  ;;  %v395_v17 = vsub.s32 (!%p198_p10), 1, %v390_v13  ;;  %s544_s13 = sshll.u32 (!%p198_p10), %s229_s10, 6  ;;  %s838_s29 = scalar_lea.sflag (!%p198_p10), [#allocation3], %s229_s10 }
  0x14   : > { %v392_v20 = vrot.slane (!%p198_p10), %v387_v14, %v391_v15  ;;  %v405_v21 = vrot.slane (!%p198_p10), %v553_v16, %v391_v15  ;;  %v396_v24 = vrot.slane (!%p198_p10), %v387_v14, %v395_v17  ;;  %v409_v25 = vrot.slane (!%p198_p10), %v553_v16, %v395_v17 }
  0x15   : > { %275 = vperm.xlu1 (!%p198_p10), %623, %v257_v4   ;;  %265 = vperm.xlu0 (!%p198_p10), %622, %v255_v5  }
  0x16   : > { %s234_s5 = scalar_select %p233_p11, %s695_s18, 1 }
  0x17   : > { %s832_s18 = scalar_lea.hbm %s888_s4, %s560_s14 }
  0x18   : > { %s559_s8 = sshll.u32 %s234_s5, 3  ;;  %s707_s5 = smov [#allocation2]  }
  0x19   : > { %s240_s21 = scalar_lea.vmem %s884_s0, %s559_s8  ;;  %s629_s6 = sshll.u32 %s707_s5, 4  ;;  %s630_s6 = int_to_ptr.vmem [resolvable:$false] %s629_s6 }
  0x1a   : > { %v249_v6 = vld [vmem:[%s240_s21] sm:$0xff]  ;;  %s231_s21 = scalar_lea.vmem [#allocation2], %s544_s13  ;;  %s631_s7 = scalar_lea.vmem %s630_s6, 2048 }
  0x1b   : > { %v279_v7 = vcombine.high %v249_v6, %v249_v6  ;;  %s444_s22 = sshll.u32 %s231_s21, 4  ;;  %s834_s22 = int_to_ptr.vmem [resolvable:$true] %s444_s22 }
  0x1c   : > { %s625_s30 = scalar_lea.vmem %s834_s22, 1024  ;;  %p632_p1 = scmp.lt.s32.totalorder %s834_s22, %s630_s6 }
  0x1d   : > { %547 = vmatprep.subr.msk.mxu0 %vm293_vm0, %v279_v7  ;;  %561 = vmatprep.subr.msk.mxu1 %vm293_vm0, %v279_v7  ;;  %p626_p12 = scmp.ne.s32.totalorder %s834_s22, %s625_s30  ;;  %p633_p2 = scmp.lt.s32.totalorder %s631_s7, %s625_s30 }
  0x1e   : > { %548 = vmatpush1.msk.msra.mxu0 %vm293_vm0, %v249_v6  ;;  %562 = vmatpush1.msk.msra.mxu1 %vm293_vm0, %v249_v6 }
  0x1f   : > { %549 = vmatmul.mubr.msk.f32.vlgmr.msra.gmra.mrb[0].mxu0 %vm280_vm1, %v250_v8  ;;  %551 = vmatmul.mubr.msk.f32.vlgmr.msra.gmra.mrb[0].mxu1 %vm280_vm1, %v252_v9  ;;  %p627_p13 = pnand %p626_p12, %p775_p4  ;;  %p634_p3 = por %p633_p2, %p632_p1 }
  0x20   : > { %368 = vmatprep.mubr.f32.mxu0 %v705_v0  ;;  %380 = vmatprep.mubr.f32.mxu1 %v705_v0 }
  0x21   : > { %p628_p0 = pneg %p627_p13 }
  0x23   : > { %550 = vmatmul.mubr.msk.f32.gmra.mrb[2].mxu0 %vm280_vm1, %v251_v10  ;;  %552 = vmatmul.mubr.msk.f32.gmra.mrb[2].mxu1 %vm280_vm1, %v253_v11  ;;  %p635_p5 = pnand %p634_p3, %p628_p0 }
  0x90   : > { %v271_v18 = vpop.permute.xlu1 %270  ;;  %v261_v19 = vpop.permute.xlu0 %260 }
  0x94   : > { %v276_v34 = vpop.permute.xlu1 %275  ;;  %v266_v35 = vpop.permute.xlu0 %265 }
  0xf2   : > { %v364_v22 = vpop.f32.mrb[0].mxu0  ;;  %v376_v23 = vpop.f32.mrb[0].mxu1 }
  0xf3   : > { %v365_v26 = vadd.f32 %v364_v22, %v261_v19  ;;  %v377_v27 = vadd.f32 %v376_v23, %v271_v18  ;;  %v366_v28 = vpop.f32.mrb[1].mxu0  ;;  %v378_v29 = vpop.f32.mrb[1].mxu1 }
  0xf4   : > { %v367_v30 = vadd.f32 %v366_v28, %v261_v19  ;;  %v379_v31 = vadd.f32 %v378_v29, %v271_v18 }
  0xf5   : > { %v412_v32 = vadd.f32 %v392_v20, %v365_v26  ;;  %v416_v33 = vadd.f32 %v405_v21, %v377_v27 }
  0xf6   : > { %v413_v36 = vadd.f32 %v396_v24, %v367_v30  ;;  %v417_v37 = vadd.f32 %v409_v25, %v379_v31  ;;  %v370_v38 = vpop.f32.mrb[2].mxu0  ;;  %v382_v39 = vpop.f32.mrb[2].mxu1 }
  0xf7   : > { %420 = vst [vmem:[%s231_s21] sm:$0xff] %v412_v32  ;;  %424 = vst [vmem:[%s231_s21 + $0x20] sm:$0xff] %v416_v33  ;;  %v371_v40 = vadd.f32 %v370_v38, %v266_v35  ;;  %v383_v41 = vadd.f32 %v382_v39, %v276_v34  ;;  %v372_v42 = vpop.f32.mrb[3].mxu0  ;;  %v384_v43 = vpop.f32.mrb[3].mxu1 }
  0xf8   : > { %421 = vst [vmem:[%s231_s21 + $0x8] sm:$0xff] %v413_v36  ;;  %425 = vst [vmem:[%s231_s21 + $0x28] sm:$0xff] %v417_v37  ;;  %v373_v44 = vadd.f32 %v372_v42, %v266_v35  ;;  %v385_v45 = vadd.f32 %v384_v43, %v276_v34 }
  0xf9   : > { %v414_v46 = vadd.f32 %v392_v20, %v371_v40  ;;  %v418_v47 = vadd.f32 %v405_v21, %v383_v41 }
  0xfa   : > { %v415_v48 = vadd.f32 %v396_v24, %v373_v44  ;;  %v419_v49 = vadd.f32 %v409_v25, %v385_v45 }
  0xfb   : > { %422 = vst [vmem:[%s231_s21 + $0x10] sm:$0xff] %v414_v46  ;;  %426 = vst [vmem:[%s231_s21 + $0x30] sm:$0xff] %v418_v47 }
  0xfc   : > { %423 = vst [vmem:[%s231_s21 + $0x18] sm:$0xff] %v415_v48  ;;  %427 = vst [vmem:[%s231_s21 + $0x38] sm:$0xff] %v419_v49 }
  0xfd   : > { %638 = shalt.err (!%p635_p5)
}
  0xfe   : > { %s639_s8 = scalar_lea.hbm %s832_s18, 1024  ;;  %s643_s11 = scalar_lea.hbm %s888_s4, 2048 }
  0xff   : > { %p640_p6 = scmp.ne.s32.totalorder %s832_s18, %s639_s8  ;;  %p644_p10 = scmp.lt.u32.totalorder %s832_s18, %s888_s4 }
 0x100   : > { %p645_p11 = scmp.lt.u32.totalorder %s643_s11, %s639_s8  ;;  %p647_p13 = scmp.lt.u32.totalorder %s639_s8, %s832_s18 }
 0x101   : > { %p641_p7 = pnand %p640_p6, %p775_p4 }
 0x102   : > { %p646_p12 = por %p645_p11, %p644_p10 }
 0x103   : > { %p642_p9 = pneg %p641_p7 }
 0x104   : > { %p648_p0 = por %p647_p13, %p646_p12 }
 0x106   : > { %p649_p1 = pnand %p648_p0, %p642_p9 }
 0x108   : > { %652 = shalt.err (!%p649_p1)
}
 0x109   : > { %s708_s14 = smov 256   ;;  %s709_s21 = smov 16  }
 0x10a   : > { %563 = dma.vmem_to_hbm [thread:$0]  (%p775_p4), %s834_s22, 1024, %s832_s18, %s838_s29, %s708_s14, %s708_s14, %s709_s21  }
 0x10b PF: > { %p569_p2 = scmp.ge.s32.totalorder %s703_s20, 2  ;;  %s459_s24 = sand.u32 1, %s683_s15  }
 0x10c   : > { %s460_s26 = scalar_lea.sflag [#allocation3], %s459_s24 }
 0x10d   : > { %p566_p3 = pnand %p569_p2, %p782_p8 }
 0x10f   : > { %678 = dma.done.wait (!%p566_p3), %s460_s26, 1024  }
 0x110   : > { %680 = vsyncadd (!%p566_p3), %s460_s26, 4294966272  ;;  %s17_s20 = sadd.s32 1, %s703_s20   ;;  %s891_s15 = smov %s687_s16 }
 0x111   : > { %p14_p5 = scmp.ge.s32.totalorder %s17_s20, 4   ;;  %s892_s16 = smov %s691_s17 }
 0x112   : > { %s893_s17 = smov %s788_s28  ;;  %s894_s18 = smov %s699_s19 }
 0x113   : > { %s895_s19 = smov %s897_s23  ;;  %16 = sbr.rel (!%p14_p5) target bundleno = 4 (0x4), region = 75 }
 0x11a   :  { %465 = vsyncpa [#allocation3], 1 }
 0x11b   :  { %467 = vsyncpa [#allocation3 + $0x1], 1 }

</bundles_post_ra>
